<compile_context>
chip_gen: v5e
topology: v5e:2x2
jax: 0.10.0
libtpu: 0.0.40
codegen_flags: <defaults>
</compile_context>

<pallas_src>
import functools

import jax
import jax.numpy as jnp
from jax.experimental import pallas as pl
from jax.experimental.pallas import tpu as pltpu


def _decoder_kernel(num_layers, B, S, E, H,
                    ids_ref,
                    hidden_ref, cell_ref, enc_ref, emb_hbm_ref,
                    attn_w_ref, attn_b_ref, v_w_ref,
                    *rest):
    nl = num_layers
    lstm_refs = rest[:2 * nl]
    ln_g_ref, ln_b_ref, fc_w_ref, fc_b_ref = rest[2 * nl:2 * nl + 4]
    pred_ref, h_out_ref, c_out_ref = rest[2 * nl + 4:2 * nl + 7]
    emb_scratch, y_scratch, dma_sems = rest[2 * nl + 7:2 * nl + 10]

    f32 = jnp.float32
    tile_idx = pl.program_id(0)

    # Heavy recurrent state is computed once (first vocab tile) and kept
    # resident in VMEM scratch for the remaining tiles.
    @pl.when(tile_idx == 0)
    def _compute_recurrent_state():
        # --- embedding row gather straight from HBM (table never fully
        # enters VMEM).  Dropout on the embeddings is identity in eval mode.
        copies = []
        for b in range(B):
            tok = ids_ref[b]
            cp = pltpu.make_async_copy(
                emb_hbm_ref.at[pl.ds(tok, 1), :],
                emb_scratch.at[pl.ds(b, 1), :],
                dma_sems.at[b])
            cp.start()
            copies.append(cp)

        # --- additive attention over encoder outputs.
        # energy matmul + context reduction on the MXU; the tiny v-dot stays
        # on the VPU/XLU to avoid a (B*S,1)->(B,S) relayout.
        enc = enc_ref[...]                                     # (B, S, H)
        enc2d = enc.reshape(B * S, H)                          # free merge
        energy = jnp.tanh(
            jnp.dot(enc2d, attn_w_ref[...], preferred_element_type=f32)
            + attn_b_ref[...])                                 # (B*S, H)
        energy3 = energy.reshape(B, S, H)
        scores = jnp.sum(energy3 * v_w_ref[...], axis=-1)      # (B, S)
        m = jnp.max(scores, axis=-1, keepdims=True)
        e = jnp.exp(scores - m)
        attn = e / jnp.sum(e, axis=-1, keepdims=True)          # softmax over S
        context = jnp.einsum('bqs,bsh->bqh', attn[:, None, :], enc,
                             preferred_element_type=f32)[:, 0, :]   # (B, H)

        for cp in copies:
            cp.wait()
        embedded = emb_scratch[...]                            # (B, E)

        # --- LSTM stack, single time step.  One fused matmul per layer
        # against [w_ih; w_hh] (stacked in the wrapper); gate order i,f,g,o.
        x_parts = [embedded, context]
        h_list, c_list = [], []
        for l in range(nl):
            w_comb = lstm_refs[2 * l][...]         # (in_l + H, 4H)
            bias = lstm_refs[2 * l + 1][...]       # (1, 4H)  (= b_ih + b_hh)
            h_prev = hidden_ref[l]                 # (B, H)
            c_prev = cell_ref[l]                   # (B, H)
            xin = jnp.concatenate(x_parts + [h_prev], axis=-1)
            gates = jnp.dot(xin, w_comb, preferred_element_type=f32) + bias
            i_g = jax.nn.sigmoid(gates[:, 0 * H:1 * H])
            f_g = jax.nn.sigmoid(gates[:, 1 * H:2 * H])
            g_g = jnp.tanh(gates[:, 2 * H:3 * H])
            o_g = jax.nn.sigmoid(gates[:, 3 * H:4 * H])
            c_new = f_g * c_prev + i_g * g_g
            h_new = o_g * jnp.tanh(c_new)
            h_list.append(h_new)
            c_list.append(c_new)
            x_parts = [h_new]        # inter-layer dropout: identity (eval)

        # Single stacked store per state tensor instead of per-layer
        # masked sub-(8,128) stores.
        h_out_ref[...] = jnp.stack(h_list, axis=0)
        c_out_ref[...] = jnp.stack(c_list, axis=0)

        # --- LayerNorm over the hidden dim; result kept for all vocab tiles.
        x = h_list[-1]
        mu = jnp.mean(x, axis=-1, keepdims=True)
        var = jnp.mean((x - mu) ** 2, axis=-1, keepdims=True)
        xn = (x - mu) * jax.lax.rsqrt(var + 1e-5)
        y_scratch[...] = xn * ln_g_ref[...] + ln_b_ref[...]    # (B, H)

    # --- vocab-tiled final projection (every grid step).  bf16 operands on
    # the MXU with f32 accumulation; fc_w tile DMA is pipelined by BlockSpec.
    y = y_scratch[...].astype(fc_w_ref.dtype)
    pred_ref[...] = (jnp.dot(y, fc_w_ref[...], preferred_element_type=f32)
                     + fc_b_ref[...])                          # (B, TILE_V)


def enhanced_decoder_forward(params, input_ids, hidden, cell, encoder_outputs,
                             *, tile_v=512):
    B, T = input_ids.shape
    assert T == 1, "single decode step"
    L, _, H = hidden.shape
    _, S, _ = encoder_outputs.shape
    V, E = params["embedding"].shape

    # Vocab tiling: lane-dense tiles (multiple of 128), pad V up.
    tile_v = max(128, (tile_v // 128) * 128)
    num_tiles = pl.cdiv(V, tile_v)
    v_pad = num_tiles * tile_v

    fc_w = jnp.pad(params["fc_w"].astype(jnp.bfloat16), ((0, 0), (0, v_pad - V)))
    fc_b = jnp.pad(params["fc_b"].astype(jnp.float32),
                   (0, v_pad - V)).reshape(1, v_pad)

    # Clamp token ids: a dynamic HBM gather has no bounds check.
    ids = jnp.clip(input_ids.reshape(B).astype(jnp.int32), 0, V - 1)

    inputs = [
        ids,                                              # scalar prefetch
        hidden.astype(jnp.float32),
        cell.astype(jnp.float32),
        encoder_outputs.astype(jnp.float32),
        params["embedding"].astype(jnp.float32),          # stays in HBM
        params["attn_w"].astype(jnp.float32),
        params["attn_b"].reshape(1, H).astype(jnp.float32),
        params["v_w"].reshape(1, H).astype(jnp.float32),
    ]
    in_specs = [
        pl.BlockSpec((L, B, H), lambda i, ids: (0, 0, 0)),     # hidden
        pl.BlockSpec((L, B, H), lambda i, ids: (0, 0, 0)),     # cell
        pl.BlockSpec((B, S, H), lambda i, ids: (0, 0, 0)),     # encoder_outputs
        pl.BlockSpec(memory_space=pl.ANY),                     # embedding (HBM)
        pl.BlockSpec((H, H), lambda i, ids: (0, 0)),           # attn_w
        pl.BlockSpec((1, H), lambda i, ids: (0, 0)),           # attn_b
        pl.BlockSpec((1, H), lambda i, ids: (0, 0)),           # v_w
    ]

    lstm_flops = 0
    for l in range(L):
        w_comb = jnp.concatenate(
            [params[f"w_ih_{l}"], params[f"w_hh_{l}"]], axis=0).astype(jnp.float32)
        in_dim = int(w_comb.shape[0])
        lstm_flops += 2 * B * in_dim * 4 * H
        inputs += [w_comb, params[f"b_{l}"].reshape(1, 4 * H).astype(jnp.float32)]
        in_specs += [pl.BlockSpec((in_dim, 4 * H), lambda i, ids: (0, 0)),
                     pl.BlockSpec((1, 4 * H), lambda i, ids: (0, 0))]

    inputs += [params["ln_g"].reshape(1, H).astype(jnp.float32),
               params["ln_b"].reshape(1, H).astype(jnp.float32),
               fc_w, fc_b]
    in_specs += [pl.BlockSpec((1, H), lambda i, ids: (0, 0)),
                 pl.BlockSpec((1, H), lambda i, ids: (0, 0)),
                 pl.BlockSpec((H, tile_v), lambda i, ids: (0, i)),   # fc_w tile
                 pl.BlockSpec((1, tile_v), lambda i, ids: (0, i))]   # fc_b tile

    out_specs = (pl.BlockSpec((B, tile_v), lambda i, ids: (0, i)),   # pred tile
                 pl.BlockSpec((L, B, H), lambda i, ids: (0, 0, 0)),  # h_out
                 pl.BlockSpec((L, B, H), lambda i, ids: (0, 0, 0)))  # c_out

    kernel = functools.partial(_decoder_kernel, L, B, S, E, H)

    flops = (2 * B * S * H * H + 4 * B * S * H + lstm_flops + 2 * B * H * v_pad)
    transcendentals = B * S * H + B * S + 5 * L * B * H
    bytes_accessed = int(
        4 * (4 * L * B * H + B * S * H + B * E + H * H + 4 * H
             + sum((E + 2 * H if l == 0 else 2 * H) * 4 * H + 4 * H
                   for l in range(L))
             + v_pad + B * v_pad)
        + 2 * H * v_pad)

    pred_pad, h_out, c_out = pl.pallas_call(
        kernel,
        out_shape=(jax.ShapeDtypeStruct((B, v_pad), jnp.float32),
                   jax.ShapeDtypeStruct((L, B, H), jnp.float32),
                   jax.ShapeDtypeStruct((L, B, H), jnp.float32)),
        grid_spec=pltpu.PrefetchScalarGridSpec(
            num_scalar_prefetch=1,
            grid=(num_tiles,),
            in_specs=in_specs,
            out_specs=out_specs,
            scratch_shapes=[
                pltpu.VMEM((B, E), jnp.float32),     # gathered embedding rows
                pltpu.VMEM((B, H), jnp.float32),     # layer-normed hidden y
                pltpu.SemaphoreType.DMA((B,)),
            ]),
        compiler_params=pltpu.CompilerParams(
            # "arbitrary": state computed at tile 0 is reused by later tiles,
            # so the vocab axis must run sequentially on one core.
            dimension_semantics=("arbitrary",),
            vmem_limit_bytes=32 * 1024 * 1024),
        cost_estimate=pl.CostEstimate(flops=flops,
                                      transcendentals=transcendentals,
                                      bytes_accessed=bytes_accessed),
    )(*inputs)
    return pred_pad[:, :V].reshape(B, 1, V), h_out, c_out


def reference_forward(params, input_ids, hidden, cell, enc):
    """Pure-JAX reference (matches PyTorch eval-mode forward)."""
    H = hidden.shape[-1]
    emb = params["embedding"][input_ids[:, 0]]                       # (B, E)
    energy = jnp.tanh(enc @ params["attn_w"] + params["attn_b"])     # (B, S, H)
    scores = jnp.sum(energy * params["v_w"], axis=-1)                # (B, S)
    w = jax.nn.softmax(scores, axis=-1)
    context = jnp.einsum("bs,bsh->bh", w, enc)
    x = jnp.concatenate([emb, context], axis=-1)
    h_out, c_out = [], []
    for l in range(hidden.shape[0]):
        gates = (x @ params[f"w_ih_{l}"] + hidden[l] @ params[f"w_hh_{l}"]
                 + params[f"b_{l}"])
        i = jax.nn.sigmoid(gates[:, :H])
        f = jax.nn.sigmoid(gates[:, H:2 * H])
        g = jnp.tanh(gates[:, 2 * H:3 * H])
        o = jax.nn.sigmoid(gates[:, 3 * H:4 * H])
        c = f * cell[l] + i * g
        h = o * jnp.tanh(c)
        h_out.append(h)
        c_out.append(c)
        x = h
    mu = x.mean(-1, keepdims=True)
    var = ((x - mu) ** 2).mean(-1, keepdims=True)
    y = (x - mu) / jnp.sqrt(var + 1e-5) * params["ln_g"] + params["ln_b"]
    pred = y @ params["fc_w"] + params["fc_b"]
    return pred[:, None, :], jnp.stack(h_out), jnp.stack(c_out)


def init_params(key, vocab_size, embedding_dim, hidden_dim, num_layers):
    V, E, H, L = vocab_size, embedding_dim, hidden_dim, num_layers
    n_keys = 6 + 4 * L
    keys = list(jax.random.split(key, n_keys))
    k = iter(keys)

    def rnd(shape, scale=0.1):
        return scale * jax.random.normal(next(k), shape, dtype=jnp.float32)

    params = {
        "embedding": rnd((V, E)),
        "attn_w": rnd((H, H)),        # (in, out)
        "attn_b": rnd((H,)),
        "v_w": rnd((H,)),
        "ln_g": jnp.ones((H,), jnp.float32),
        "ln_b": jnp.zeros((H,), jnp.float32),
        "fc_w": rnd((H, V)),          # (in, out)
        "fc_b": rnd((V,)),
    }
    for l in range(L):
        in_dim = E + H if l == 0 else H
        params[f"w_ih_{l}"] = rnd((in_dim, 4 * H))        # (in, 4H)
        params[f"w_hh_{l}"] = rnd((H, 4 * H))
        params[f"b_{l}"] = rnd((4 * H,)) + rnd((4 * H,))  # b_ih + b_hh
    return params


if __name__ == "__main__":
    # Small shapes; V chosen so the vocab-tiled fc exercises padding plus a
    # multi-tile grid (V=300, tile_v=128 -> 3 tiles of 128, padded to 384).
    B, S, E, H, L, V = 2, 8, 16, 32, 2, 300

    key = jax.random.PRNGKey(0)
    kp, k1, k2, k3, k4 = jax.random.split(key, 5)

    params = init_params(kp, V, E, H, L)
    input_ids = jax.random.randint(k1, (B, 1), 0, V, dtype=jnp.int32)
    hidden = jax.random.normal(k2, (L, B, H), dtype=jnp.float32)
    cell = jax.random.normal(k3, (L, B, H), dtype=jnp.float32)
    encoder_outputs = jax.random.normal(k4, (B, S, H), dtype=jnp.float32)

    pred, h_new, c_new = enhanced_decoder_forward(
        params, input_ids, hidden, cell, encoder_outputs, tile_v=128)
    jax.block_until_ready((pred, h_new, c_new))

    pred_r, h_r, c_r = reference_forward(
        params, input_ids, hidden, cell, encoder_outputs)
    assert pred.shape == (B, 1, V) and h_new.shape == (L, B, H)
    assert jnp.allclose(pred, pred_r, atol=2e-2, rtol=2e-2)
    assert jnp.allclose(h_new, h_r, atol=2e-2, rtol=2e-2)
    assert jnp.allclose(c_new, c_r, atol=2e-2, rtol=2e-2)

    print("KERNEL_OK")
</pallas_src>

<mosaic_0001>
module attributes {stable_mosaic.version = 11 : i64} {
  func.func @_decoder_kernel(%arg0: i32, %arg1: memref<2xi32, #tpu.memory_space<smem>>, %arg2: memref<2x2x32xf32, #tpu.memory_space<vmem>>, %arg3: memref<2x2x32xf32, #tpu.memory_space<vmem>>, %arg4: memref<2x8x32xf32, #tpu.memory_space<vmem>>, %arg5: memref<300x16xf32, #tpu.memory_space<any>>, %arg6: memref<32x32xf32, #tpu.memory_space<vmem>>, %arg7: memref<1x32xf32, #tpu.memory_space<vmem>>, %arg8: memref<1x32xf32, #tpu.memory_space<vmem>>, %arg9: memref<80x128xf32, #tpu.memory_space<vmem>>, %arg10: memref<1x128xf32, #tpu.memory_space<vmem>>, %arg11: memref<64x128xf32, #tpu.memory_space<vmem>>, %arg12: memref<1x128xf32, #tpu.memory_space<vmem>>, %arg13: memref<1x32xf32, #tpu.memory_space<vmem>>, %arg14: memref<1x32xf32, #tpu.memory_space<vmem>>, %arg15: memref<32x128xbf16, #tpu.memory_space<vmem>>, %arg16: memref<1x128xf32, #tpu.memory_space<vmem>>, %arg17: memref<2x128xf32, #tpu.memory_space<vmem>>, %arg18: memref<2x2x32xf32, #tpu.memory_space<vmem>>, %arg19: memref<2x2x32xf32, #tpu.memory_space<vmem>>, %arg20: memref<2x16xf32, #tpu.memory_space<vmem>>, %arg21: memref<2x32xf32, #tpu.memory_space<vmem>>, %arg22: memref<2x!tpu.dma_semaphore, #tpu.memory_space<semaphore_mem>>) attributes {dimension_semantics = [#tpu.dimension_semantics<arbitrary>], iteration_bounds = array<i64: 3>, scalar_prefetch = 1 : i64, scratch_operands = 3 : i64, tpu.core_type = #tpu.core_type<tc>, window_params = [{pipeline_mode = #tpu.pipeline_mode<synchronous>, transform_indices = @transform_0, window_bounds = array<i64: 2, 2, 32>}, {pipeline_mode = #tpu.pipeline_mode<synchronous>, transform_indices = @transform_1, window_bounds = array<i64: 2, 2, 32>}, {pipeline_mode = #tpu.pipeline_mode<synchronous>, transform_indices = @transform_2, window_bounds = array<i64: 2, 8, 32>}, {}, {pipeline_mode = #tpu.pipeline_mode<synchronous>, transform_indices = @transform_4, window_bounds = array<i64: 32, 32>}, {pipeline_mode = #tpu.pipeline_mode<synchronous>, transform_indices = @transform_5, window_bounds = array<i64: 1, 32>}, {pipeline_mode = #tpu.pipeline_mode<synchronous>, transform_indices = @transform_6, window_bounds = array<i64: 1, 32>}, {pipeline_mode = #tpu.pipeline_mode<synchronous>, transform_indices = @transform_7, window_bounds = array<i64: 80, 128>}, {pipeline_mode = #tpu.pipeline_mode<synchronous>, transform_indices = @transform_8, window_bounds = array<i64: 1, 128>}, {pipeline_mode = #tpu.pipeline_mode<synchronous>, transform_indices = @transform_9, window_bounds = array<i64: 64, 128>}, {pipeline_mode = #tpu.pipeline_mode<synchronous>, transform_indices = @transform_10, window_bounds = array<i64: 1, 128>}, {pipeline_mode = #tpu.pipeline_mode<synchronous>, transform_indices = @transform_11, window_bounds = array<i64: 1, 32>}, {pipeline_mode = #tpu.pipeline_mode<synchronous>, transform_indices = @transform_12, window_bounds = array<i64: 1, 32>}, {transform_indices = @transform_13, window_bounds = array<i64: 32, 128>}, {transform_indices = @transform_14, window_bounds = array<i64: 1, 128>}, {transform_indices = @transform_15, window_bounds = array<i64: 2, 128>}, {pipeline_mode = #tpu.pipeline_mode<synchronous>, transform_indices = @transform_16, window_bounds = array<i64: 2, 2, 32>}, {pipeline_mode = #tpu.pipeline_mode<synchronous>, transform_indices = @transform_17, window_bounds = array<i64: 2, 2, 32>}]} {
    %c0_i32 = arith.constant 0 : i32
    %0 = arith.cmpi eq, %arg0, %c0_i32 : i32
    %1 = arith.extui %0 : i1 to i32
    %c0_i32_0 = arith.constant 0 : i32
    %2 = arith.cmpi ne, %1, %c0_i32_0 : i32
    scf.if %2 {
      %c0_8 = arith.constant 0 : index
      %11 = memref.load %arg1[%c0_8] : memref<2xi32, #tpu.memory_space<smem>>
      %c0_i32_9 = arith.constant 0 : i32
      %c0_i32_10 = arith.constant 0 : i32
      %12 = tpu.memref_slice %arg5[%11, %c0_i32_10] : memref<300x16xf32, #tpu.memory_space<any>> -> memref<1x16xf32, #tpu.memory_space<any>>
      %c0_i32_11 = arith.constant 0 : i32
      %c0_i32_12 = arith.constant 0 : i32
      %13 = tpu.memref_slice %arg20[%c0_i32_11, %c0_i32_12] : memref<2x16xf32, #tpu.memory_space<vmem>> -> memref<1x16xf32, #tpu.memory_space<vmem>>
      %14 = tpu.memref_slice %arg22[%c0_i32_9] : memref<2x!tpu.dma_semaphore, #tpu.memory_space<semaphore_mem>> -> memref<1x!tpu.dma_semaphore, #tpu.memory_space<semaphore_mem>>
      %15 = tpu.memref_squeeze %14 : memref<1x!tpu.dma_semaphore, #tpu.memory_space<semaphore_mem>> -> memref<!tpu.dma_semaphore, #tpu.memory_space<semaphore_mem>>
      tpu.enqueue_dma source(%12 : memref<1x16xf32, #tpu.memory_space<any>>) target(%13 : memref<1x16xf32, #tpu.memory_space<vmem>>) target_semaphore(%15 : memref<!tpu.dma_semaphore, #tpu.memory_space<semaphore_mem>>)
      %c1 = arith.constant 1 : index
      %16 = memref.load %arg1[%c1] : memref<2xi32, #tpu.memory_space<smem>>
      %c1_i32 = arith.constant 1 : i32
      %c0_i32_13 = arith.constant 0 : i32
      %17 = tpu.memref_slice %arg5[%16, %c0_i32_13] : memref<300x16xf32, #tpu.memory_space<any>> -> memref<1x16xf32, #tpu.memory_space<any>>
      %c1_i32_14 = arith.constant 1 : i32
      %c0_i32_15 = arith.constant 0 : i32
      %18 = tpu.memref_slice %arg20[%c1_i32_14, %c0_i32_15] : memref<2x16xf32, #tpu.memory_space<vmem>> -> memref<1x16xf32, #tpu.memory_space<vmem>>
      %19 = tpu.memref_slice %arg22[%c1_i32] : memref<2x!tpu.dma_semaphore, #tpu.memory_space<semaphore_mem>> -> memref<1x!tpu.dma_semaphore, #tpu.memory_space<semaphore_mem>>
      %20 = tpu.memref_squeeze %19 : memref<1x!tpu.dma_semaphore, #tpu.memory_space<semaphore_mem>> -> memref<!tpu.dma_semaphore, #tpu.memory_space<semaphore_mem>>
      tpu.enqueue_dma source(%17 : memref<1x16xf32, #tpu.memory_space<any>>) target(%18 : memref<1x16xf32, #tpu.memory_space<vmem>>) target_semaphore(%20 : memref<!tpu.dma_semaphore, #tpu.memory_space<semaphore_mem>>)
      %c0_16 = arith.constant 0 : index
      %c0_17 = arith.constant 0 : index
      %c0_18 = arith.constant 0 : index
      %21 = vector.load %arg4[%c0_16, %c0_17, %c0_18] : memref<2x8x32xf32, #tpu.memory_space<vmem>>, vector<2x8x32xf32>
      %22 = vector.shape_cast %21 : vector<2x8x32xf32> to vector<16x32xf32>
      %c0_19 = arith.constant 0 : index
      %c0_20 = arith.constant 0 : index
      %23 = vector.load %arg6[%c0_19, %c0_20] : memref<32x32xf32, #tpu.memory_space<vmem>>, vector<32x32xf32>
      %cst_21 = arith.constant dense<0.000000e+00> : vector<16x32xf32>
      %24 = tpu.matmul %22, %23, %cst_21 {dimension_numbers = #tpu.dot_dimension_numbers<[1], [0], [0], [1], [0, 0, 1, 1], [], []>} : vector<16x32xf32>, vector<32x32xf32>, vector<16x32xf32> -> vector<16x32xf32>
      %c0_22 = arith.constant 0 : index
      %c0_23 = arith.constant 0 : index
      %25 = vector.load %arg7[%c0_22, %c0_23] : memref<1x32xf32, #tpu.memory_space<vmem>>, vector<1x32xf32>
      %26 = vector.broadcast %25 : vector<1x32xf32> to vector<16x32xf32>
      %27 = arith.addf %24, %26 : vector<16x32xf32>
      %28 = math.tanh %27 : vector<16x32xf32>
      %29 = vector.shape_cast %28 : vector<16x32xf32> to vector<2x8x32xf32>
      %c0_24 = arith.constant 0 : index
      %c0_25 = arith.constant 0 : index
      %30 = vector.load %arg8[%c0_24, %c0_25] : memref<1x32xf32, #tpu.memory_space<vmem>>, vector<1x32xf32>
      %31 = vector.shape_cast %30 : vector<1x32xf32> to vector<1x1x32xf32>
      %32 = vector.broadcast %31 : vector<1x1x32xf32> to vector<2x8x32xf32>
      %33 = arith.mulf %29, %32 : vector<2x8x32xf32>
      %cst_26 = arith.constant dense<0.000000e+00> : vector<2x8xf32>
      %34 = vector.multi_reduction <add>, %33, %cst_26 [2] : vector<2x8x32xf32> to vector<2x8xf32>
      %cst_27 = arith.constant dense<0xFF800000> : vector<2xf32>
      %35 = vector.multi_reduction <maximumf>, %34, %cst_27 [1] : vector<2x8xf32> to vector<2xf32>
      %36 = vector.shape_cast %35 : vector<2xf32> to vector<2x1xf32>
      %37 = vector.broadcast %36 : vector<2x1xf32> to vector<2x8xf32>
      %38 = arith.subf %34, %37 : vector<2x8xf32>
      %39 = math.exp %38 : vector<2x8xf32>
      %cst_28 = arith.constant dense<0.000000e+00> : vector<2xf32>
      %40 = vector.multi_reduction <add>, %39, %cst_28 [1] : vector<2x8xf32> to vector<2xf32>
      %41 = vector.shape_cast %40 : vector<2xf32> to vector<2x1xf32>
      %42 = vector.broadcast %41 : vector<2x1xf32> to vector<2x8xf32>
      %43 = arith.divf %39, %42 : vector<2x8xf32>
      %44 = vector.shape_cast %43 : vector<2x8xf32> to vector<2x1x8xf32>
      "tpu.trace_start"() <{level = 10 : i32, message = "bqs,bsh->bqh"}> : () -> ()
      %cst_29 = arith.constant dense<0.000000e+00> : vector<2x1x32xf32>
      %45 = tpu.matmul %44, %21, %cst_29 {dimension_numbers = #tpu.dot_dimension_numbers<[2], [1], [1], [2], [0, 0, 0, 1, 1, 2], [0], [0]>} : vector<2x1x8xf32>, vector<2x8x32xf32>, vector<2x1x32xf32> -> vector<2x1x32xf32>
      "tpu.trace_stop"() : () -> ()
      %46 = vector.shape_cast %45 : vector<2x1x32xf32> to vector<2x32xf32>
      %c0_i32_30 = arith.constant 0 : i32
      %c0_i32_31 = arith.constant 0 : i32
      %47 = tpu.memref_slice %arg5[%11, %c0_i32_31] : memref<300x16xf32, #tpu.memory_space<any>> -> memref<1x16xf32, #tpu.memory_space<any>>
      %c0_i32_32 = arith.constant 0 : i32
      %c0_i32_33 = arith.constant 0 : i32
      %48 = tpu.memref_slice %arg20[%c0_i32_32, %c0_i32_33] : memref<2x16xf32, #tpu.memory_space<vmem>> -> memref<1x16xf32, #tpu.memory_space<vmem>>
      %49 = tpu.memref_slice %arg22[%c0_i32_30] : memref<2x!tpu.dma_semaphore, #tpu.memory_space<semaphore_mem>> -> memref<1x!tpu.dma_semaphore, #tpu.memory_space<semaphore_mem>>
      %50 = tpu.memref_squeeze %49 : memref<1x!tpu.dma_semaphore, #tpu.memory_space<semaphore_mem>> -> memref<!tpu.dma_semaphore, #tpu.memory_space<semaphore_mem>>
      tpu.wait_dma2 semaphore(%50 : memref<!tpu.dma_semaphore, #tpu.memory_space<semaphore_mem>>) src(%47 : memref<1x16xf32, #tpu.memory_space<any>>) dst(%48 : memref<1x16xf32, #tpu.memory_space<vmem>>)
      %c1_i32_34 = arith.constant 1 : i32
      %c0_i32_35 = arith.constant 0 : i32
      %51 = tpu.memref_slice %arg5[%16, %c0_i32_35] : memref<300x16xf32, #tpu.memory_space<any>> -> memref<1x16xf32, #tpu.memory_space<any>>
      %c1_i32_36 = arith.constant 1 : i32
      %c0_i32_37 = arith.constant 0 : i32
      %52 = tpu.memref_slice %arg20[%c1_i32_36, %c0_i32_37] : memref<2x16xf32, #tpu.memory_space<vmem>> -> memref<1x16xf32, #tpu.memory_space<vmem>>
      %53 = tpu.memref_slice %arg22[%c1_i32_34] : memref<2x!tpu.dma_semaphore, #tpu.memory_space<semaphore_mem>> -> memref<1x!tpu.dma_semaphore, #tpu.memory_space<semaphore_mem>>
      %54 = tpu.memref_squeeze %53 : memref<1x!tpu.dma_semaphore, #tpu.memory_space<semaphore_mem>> -> memref<!tpu.dma_semaphore, #tpu.memory_space<semaphore_mem>>
      tpu.wait_dma2 semaphore(%54 : memref<!tpu.dma_semaphore, #tpu.memory_space<semaphore_mem>>) src(%51 : memref<1x16xf32, #tpu.memory_space<any>>) dst(%52 : memref<1x16xf32, #tpu.memory_space<vmem>>)
      %c0_38 = arith.constant 0 : index
      %c0_39 = arith.constant 0 : index
      %55 = vector.load %arg20[%c0_38, %c0_39] : memref<2x16xf32, #tpu.memory_space<vmem>>, vector<2x16xf32>
      %c0_40 = arith.constant 0 : index
      %c0_41 = arith.constant 0 : index
      %56 = vector.load %arg9[%c0_40, %c0_41] : memref<80x128xf32, #tpu.memory_space<vmem>>, vector<80x128xf32>
      %c0_42 = arith.constant 0 : index
      %c0_43 = arith.constant 0 : index
      %57 = vector.load %arg10[%c0_42, %c0_43] : memref<1x128xf32, #tpu.memory_space<vmem>>, vector<1x128xf32>
      %c0_44 = arith.constant 0 : index
      %c0_45 = arith.constant 0 : index
      %c0_46 = arith.constant 0 : index
      %58 = vector.load %arg2[%c0_44, %c0_45, %c0_46] : memref<2x2x32xf32, #tpu.memory_space<vmem>>, vector<1x2x32xf32>
      %59 = vector.shape_cast %58 : vector<1x2x32xf32> to vector<2x32xf32>
      %c0_47 = arith.constant 0 : index
      %c0_48 = arith.constant 0 : index
      %c0_49 = arith.constant 0 : index
      %60 = vector.load %arg3[%c0_47, %c0_48, %c0_49] : memref<2x2x32xf32, #tpu.memory_space<vmem>>, vector<1x2x32xf32>
      %61 = vector.shape_cast %60 : vector<1x2x32xf32> to vector<2x32xf32>
      %62 = tpu.concatenate %55, %46, %59 in 1 : vector<2x16xf32>, vector<2x32xf32>, vector<2x32xf32> -> vector<2x80xf32>
      %cst_50 = arith.constant dense<0.000000e+00> : vector<2x128xf32>
      %63 = tpu.matmul %62, %56, %cst_50 {dimension_numbers = #tpu.dot_dimension_numbers<[1], [0], [0], [1], [0, 0, 1, 1], [], []>} : vector<2x80xf32>, vector<80x128xf32>, vector<2x128xf32> -> vector<2x128xf32>
      %64 = vector.broadcast %57 : vector<1x128xf32> to vector<2x128xf32>
      %65 = arith.addf %63, %64 : vector<2x128xf32>
      %66 = vector.extract_strided_slice %65 {offsets = [0, 0], sizes = [2, 32], strides = [1, 1]} : vector<2x128xf32> to vector<2x32xf32>
      %67 = arith.negf %66 : vector<2x32xf32>
      %68 = math.exp %67 : vector<2x32xf32>
      %cst_51 = arith.constant 1.000000e+00 : f32
      %69 = vector.broadcast %cst_51 : f32 to vector<2x32xf32>
      %70 = arith.addf %69, %68 : vector<2x32xf32>
      %71 = arith.divf %69, %70 : vector<2x32xf32>
      %72 = vector.extract_strided_slice %65 {offsets = [0, 32], sizes = [2, 32], strides = [1, 1]} : vector<2x128xf32> to vector<2x32xf32>
      %73 = arith.negf %72 : vector<2x32xf32>
      %74 = math.exp %73 : vector<2x32xf32>
      %cst_52 = arith.constant 1.000000e+00 : f32
      %75 = vector.broadcast %cst_52 : f32 to vector<2x32xf32>
      %76 = arith.addf %75, %74 : vector<2x32xf32>
      %77 = arith.divf %75, %76 : vector<2x32xf32>
      %78 = vector.extract_strided_slice %65 {offsets = [0, 64], sizes = [2, 32], strides = [1, 1]} : vector<2x128xf32> to vector<2x32xf32>
      %79 = math.tanh %78 : vector<2x32xf32>
      %80 = vector.extract_strided_slice %65 {offsets = [0, 96], sizes = [2, 32], strides = [1, 1]} : vector<2x128xf32> to vector<2x32xf32>
      %81 = arith.negf %80 : vector<2x32xf32>
      %82 = math.exp %81 : vector<2x32xf32>
      %cst_53 = arith.constant 1.000000e+00 : f32
      %83 = vector.broadcast %cst_53 : f32 to vector<2x32xf32>
      %84 = arith.addf %83, %82 : vector<2x32xf32>
      %85 = arith.divf %83, %84 : vector<2x32xf32>
      %86 = arith.mulf %77, %61 : vector<2x32xf32>
      %87 = arith.mulf %71, %79 : vector<2x32xf32>
      %88 = arith.addf %86, %87 : vector<2x32xf32>
      %89 = math.tanh %88 : vector<2x32xf32>
      %90 = arith.mulf %85, %89 : vector<2x32xf32>
      %c0_54 = arith.constant 0 : index
      %c0_55 = arith.constant 0 : index
      %91 = vector.load %arg11[%c0_54, %c0_55] : memref<64x128xf32, #tpu.memory_space<vmem>>, vector<64x128xf32>
      %c0_56 = arith.constant 0 : index
      %c0_57 = arith.constant 0 : index
      %92 = vector.load %arg12[%c0_56, %c0_57] : memref<1x128xf32, #tpu.memory_space<vmem>>, vector<1x128xf32>
      %c1_58 = arith.constant 1 : index
      %c0_59 = arith.constant 0 : index
      %c0_60 = arith.constant 0 : index
      %93 = vector.load %arg2[%c1_58, %c0_59, %c0_60] : memref<2x2x32xf32, #tpu.memory_space<vmem>>, vector<1x2x32xf32>
      %94 = vector.shape_cast %93 : vector<1x2x32xf32> to vector<2x32xf32>
      %c1_61 = arith.constant 1 : index
      %c0_62 = arith.constant 0 : index
      %c0_63 = arith.constant 0 : index
      %95 = vector.load %arg3[%c1_61, %c0_62, %c0_63] : memref<2x2x32xf32, #tpu.memory_space<vmem>>, vector<1x2x32xf32>
      %96 = vector.shape_cast %95 : vector<1x2x32xf32> to vector<2x32xf32>
      %97 = tpu.concatenate %90, %94 in 1 : vector<2x32xf32>, vector<2x32xf32> -> vector<2x64xf32>
      %cst_64 = arith.constant dense<0.000000e+00> : vector<2x128xf32>
      %98 = tpu.matmul %97, %91, %cst_64 {dimension_numbers = #tpu.dot_dimension_numbers<[1], [0], [0], [1], [0, 0, 1, 1], [], []>} : vector<2x64xf32>, vector<64x128xf32>, vector<2x128xf32> -> vector<2x128xf32>
      %99 = vector.broadcast %92 : vector<1x128xf32> to vector<2x128xf32>
      %100 = arith.addf %98, %99 : vector<2x128xf32>
      %101 = vector.extract_strided_slice %100 {offsets = [0, 0], sizes = [2, 32], strides = [1, 1]} : vector<2x128xf32> to vector<2x32xf32>
      %102 = arith.negf %101 : vector<2x32xf32>
      %103 = math.exp %102 : vector<2x32xf32>
      %cst_65 = arith.constant 1.000000e+00 : f32
      %104 = vector.broadcast %cst_65 : f32 to vector<2x32xf32>
      %105 = arith.addf %104, %103 : vector<2x32xf32>
      %106 = arith.divf %104, %105 : vector<2x32xf32>
      %107 = vector.extract_strided_slice %100 {offsets = [0, 32], sizes = [2, 32], strides = [1, 1]} : vector<2x128xf32> to vector<2x32xf32>
      %108 = arith.negf %107 : vector<2x32xf32>
      %109 = math.exp %108 : vector<2x32xf32>
      %cst_66 = arith.constant 1.000000e+00 : f32
      %110 = vector.broadcast %cst_66 : f32 to vector<2x32xf32>
      %111 = arith.addf %110, %109 : vector<2x32xf32>
      %112 = arith.divf %110, %111 : vector<2x32xf32>
      %113 = vector.extract_strided_slice %100 {offsets = [0, 64], sizes = [2, 32], strides = [1, 1]} : vector<2x128xf32> to vector<2x32xf32>
      %114 = math.tanh %113 : vector<2x32xf32>
      %115 = vector.extract_strided_slice %100 {offsets = [0, 96], sizes = [2, 32], strides = [1, 1]} : vector<2x128xf32> to vector<2x32xf32>
      %116 = arith.negf %115 : vector<2x32xf32>
      %117 = math.exp %116 : vector<2x32xf32>
      %cst_67 = arith.constant 1.000000e+00 : f32
      %118 = vector.broadcast %cst_67 : f32 to vector<2x32xf32>
      %119 = arith.addf %118, %117 : vector<2x32xf32>
      %120 = arith.divf %118, %119 : vector<2x32xf32>
      %121 = arith.mulf %112, %96 : vector<2x32xf32>
      %122 = arith.mulf %106, %114 : vector<2x32xf32>
      %123 = arith.addf %121, %122 : vector<2x32xf32>
      %124 = math.tanh %123 : vector<2x32xf32>
      %125 = arith.mulf %120, %124 : vector<2x32xf32>
      %126 = vector.shape_cast %90 : vector<2x32xf32> to vector<1x2x32xf32>
      %127 = vector.shape_cast %125 : vector<2x32xf32> to vector<1x2x32xf32>
      %128 = tpu.concatenate %126, %127 in 0 : vector<1x2x32xf32>, vector<1x2x32xf32> -> vector<2x2x32xf32>
      %c0_68 = arith.constant 0 : index
      %c0_69 = arith.constant 0 : index
      %c0_70 = arith.constant 0 : index
      %129 = vector.load %arg18[%c0_68, %c0_69, %c0_70] : memref<2x2x32xf32, #tpu.memory_space<vmem>>, vector<2x2x32xf32>
      tpu.vector_store %arg18[%c0_68, %c0_69, %c0_70], %128 {strides = array<i32>} : memref<2x2x32xf32, #tpu.memory_space<vmem>>, vector<2x2x32xf32>,
      %130 = vector.shape_cast %88 : vector<2x32xf32> to vector<1x2x32xf32>
      %131 = vector.shape_cast %123 : vector<2x32xf32> to vector<1x2x32xf32>
      %132 = tpu.concatenate %130, %131 in 0 : vector<1x2x32xf32>, vector<1x2x32xf32> -> vector<2x2x32xf32>
      %c0_71 = arith.constant 0 : index
      %c0_72 = arith.constant 0 : index
      %c0_73 = arith.constant 0 : index
      %133 = vector.load %arg19[%c0_71, %c0_72, %c0_73] : memref<2x2x32xf32, #tpu.memory_space<vmem>>, vector<2x2x32xf32>
      tpu.vector_store %arg19[%c0_71, %c0_72, %c0_73], %132 {strides = array<i32>} : memref<2x2x32xf32, #tpu.memory_space<vmem>>, vector<2x2x32xf32>,
      %cst_74 = arith.constant dense<0.000000e+00> : vector<2xf32>
      %134 = vector.multi_reduction <add>, %125, %cst_74 [1] : vector<2x32xf32> to vector<2xf32>
      %135 = vector.shape_cast %134 : vector<2xf32> to vector<2x1xf32>
      %cst_75 = arith.constant 3.200000e+01 : f32
      %136 = vector.broadcast %cst_75 : f32 to vector<2x1xf32>
      %137 = arith.divf %135, %136 : vector<2x1xf32>
      %138 = vector.broadcast %137 : vector<2x1xf32> to vector<2x32xf32>
      %139 = arith.subf %125, %138 : vector<2x32xf32>
      %140 = arith.mulf %139, %139 : vector<2x32xf32>
      %cst_76 = arith.constant dense<0.000000e+00> : vector<2xf32>
      %141 = vector.multi_reduction <add>, %140, %cst_76 [1] : vector<2x32xf32> to vector<2xf32>
      %142 = vector.shape_cast %141 : vector<2xf32> to vector<2x1xf32>
      %cst_77 = arith.constant 3.200000e+01 : f32
      %143 = vector.broadcast %cst_77 : f32 to vector<2x1xf32>
      %144 = arith.divf %142, %143 : vector<2x1xf32>
      %145 = vector.broadcast %137 : vector<2x1xf32> to vector<2x32xf32>
      %146 = arith.subf %125, %145 : vector<2x32xf32>
      %cst_78 = arith.constant 9.99999974E-6 : f32
      %147 = vector.broadcast %cst_78 : f32 to vector<2x1xf32>
      %148 = arith.addf %144, %147 : vector<2x1xf32>
      %149 = math.rsqrt %148 : vector<2x1xf32>
      %150 = vector.broadcast %149 : vector<2x1xf32> to vector<2x32xf32>
      %151 = arith.mulf %146, %150 : vector<2x32xf32>
      %c0_79 = arith.constant 0 : index
      %c0_80 = arith.constant 0 : index
      %152 = vector.load %arg13[%c0_79, %c0_80] : memref<1x32xf32, #tpu.memory_space<vmem>>, vector<1x32xf32>
      %153 = vector.broadcast %152 : vector<1x32xf32> to vector<2x32xf32>
      %154 = arith.mulf %151, %153 : vector<2x32xf32>
      %c0_81 = arith.constant 0 : index
      %c0_82 = arith.constant 0 : index
      %155 = vector.load %arg14[%c0_81, %c0_82] : memref<1x32xf32, #tpu.memory_space<vmem>>, vector<1x32xf32>
      %156 = vector.broadcast %155 : vector<1x32xf32> to vector<2x32xf32>
      %157 = arith.addf %154, %156 : vector<2x32xf32>
      %c0_83 = arith.constant 0 : index
      %c0_84 = arith.constant 0 : index
      %158 = vector.load %arg21[%c0_83, %c0_84] : memref<2x32xf32, #tpu.memory_space<vmem>>, vector<2x32xf32>
      tpu.vector_store %arg21[%c0_83, %c0_84], %157 {strides = array<i32>} : memref<2x32xf32, #tpu.memory_space<vmem>>, vector<2x32xf32>,
    } else {
    }
    %c0 = arith.constant 0 : index
    %c0_1 = arith.constant 0 : index
    %3 = vector.load %arg21[%c0, %c0_1] : memref<2x32xf32, #tpu.memory_space<vmem>>, vector<2x32xf32>
    %4 = arith.truncf %3 : vector<2x32xf32> to vector<2x32xbf16>
    %c0_2 = arith.constant 0 : index
    %c0_3 = arith.constant 0 : index
    %5 = vector.load %arg15[%c0_2, %c0_3] : memref<32x128xbf16, #tpu.memory_space<vmem>>, vector<32x128xbf16>
    %cst = arith.constant dense<0.000000e+00> : vector<2x128xf32>
    %6 = tpu.matmul %4, %5, %cst {dimension_numbers = #tpu.dot_dimension_numbers<[1], [0], [0], [1], [0, 0, 1, 1], [], []>} : vector<2x32xbf16>, vector<32x128xbf16>, vector<2x128xf32> -> vector<2x128xf32>
    %c0_4 = arith.constant 0 : index
    %c0_5 = arith.constant 0 : index
    %7 = vector.load %arg16[%c0_4, %c0_5] : memref<1x128xf32, #tpu.memory_space<vmem>>, vector<1x128xf32>
    %8 = vector.broadcast %7 : vector<1x128xf32> to vector<2x128xf32>
    %9 = arith.addf %6, %8 : vector<2x128xf32>
    %c0_6 = arith.constant 0 : index
    %c0_7 = arith.constant 0 : index
    %10 = vector.load %arg17[%c0_6, %c0_7] : memref<2x128xf32, #tpu.memory_space<vmem>>, vector<2x128xf32>
    tpu.vector_store %arg17[%c0_6, %c0_7], %9 {strides = array<i32>} : memref<2x128xf32, #tpu.memory_space<vmem>>, vector<2x128xf32>,
    return
  }
  func.func @transform_0(%arg0: i32, %arg1: memref<2xi32, #tpu.memory_space<smem>>) -> (i32, i32, i32) {
    %c0_i32 = arith.constant 0 : i32
    %c0_i32_0 = arith.constant 0 : i32
    %c0_i32_1 = arith.constant 0 : i32
    %c0_i32_2 = arith.constant 0 : i32
    return %c0_i32, %c0_i32_0, %c0_i32_1 : i32, i32, i32
  }
  func.func @transform_1(%arg0: i32, %arg1: memref<2xi32, #tpu.memory_space<smem>>) -> (i32, i32, i32) {
    %c0_i32 = arith.constant 0 : i32
    %c0_i32_0 = arith.constant 0 : i32
    %c0_i32_1 = arith.constant 0 : i32
    %c0_i32_2 = arith.constant 0 : i32
    return %c0_i32, %c0_i32_0, %c0_i32_1 : i32, i32, i32
  }
  func.func @transform_2(%arg0: i32, %arg1: memref<2xi32, #tpu.memory_space<smem>>) -> (i32, i32, i32) {
    %c0_i32 = arith.constant 0 : i32
    %c0_i32_0 = arith.constant 0 : i32
    %c0_i32_1 = arith.constant 0 : i32
    %c0_i32_2 = arith.constant 0 : i32
    return %c0_i32, %c0_i32_0, %c0_i32_1 : i32, i32, i32
  }
  func.func @transform_4(%arg0: i32, %arg1: memref<2xi32, #tpu.memory_space<smem>>) -> (i32, i32) {
    %c0_i32 = arith.constant 0 : i32
    %c0_i32_0 = arith.constant 0 : i32
    %c0_i32_1 = arith.constant 0 : i32
    return %c0_i32, %c0_i32_0 : i32, i32
  }
  func.func @transform_5(%arg0: i32, %arg1: memref<2xi32, #tpu.memory_space<smem>>) -> (i32, i32) {
    %c0_i32 = arith.constant 0 : i32
    %c0_i32_0 = arith.constant 0 : i32
    %c0_i32_1 = arith.constant 0 : i32
    return %c0_i32, %c0_i32_0 : i32, i32
  }
  func.func @transform_6(%arg0: i32, %arg1: memref<2xi32, #tpu.memory_space<smem>>) -> (i32, i32) {
    %c0_i32 = arith.constant 0 : i32
    %c0_i32_0 = arith.constant 0 : i32
    %c0_i32_1 = arith.constant 0 : i32
    return %c0_i32, %c0_i32_0 : i32, i32
  }
  func.func @transform_7(%arg0: i32, %arg1: memref<2xi32, #tpu.memory_space<smem>>) -> (i32, i32) {
    %c0_i32 = arith.constant 0 : i32
    %c0_i32_0 = arith.constant 0 : i32
    %c0_i32_1 = arith.constant 0 : i32
    return %c0_i32, %c0_i32_0 : i32, i32
  }
  func.func @transform_8(%arg0: i32, %arg1: memref<2xi32, #tpu.memory_space<smem>>) -> (i32, i32) {
    %c0_i32 = arith.constant 0 : i32
    %c0_i32_0 = arith.constant 0 : i32
    %c0_i32_1 = arith.constant 0 : i32
    return %c0_i32, %c0_i32_0 : i32, i32
  }
  func.func @transform_9(%arg0: i32, %arg1: memref<2xi32, #tpu.memory_space<smem>>) -> (i32, i32) {
    %c0_i32 = arith.constant 0 : i32
    %c0_i32_0 = arith.constant 0 : i32
    %c0_i32_1 = arith.constant 0 : i32
    return %c0_i32, %c0_i32_0 : i32, i32
  }
  func.func @transform_10(%arg0: i32, %arg1: memref<2xi32, #tpu.memory_space<smem>>) -> (i32, i32) {
    %c0_i32 = arith.constant 0 : i32
    %c0_i32_0 = arith.constant 0 : i32
    %c0_i32_1 = arith.constant 0 : i32
    return %c0_i32, %c0_i32_0 : i32, i32
  }
  func.func @transform_11(%arg0: i32, %arg1: memref<2xi32, #tpu.memory_space<smem>>) -> (i32, i32) {
    %c0_i32 = arith.constant 0 : i32
    %c0_i32_0 = arith.constant 0 : i32
    %c0_i32_1 = arith.constant 0 : i32
    return %c0_i32, %c0_i32_0 : i32, i32
  }
  func.func @transform_12(%arg0: i32, %arg1: memref<2xi32, #tpu.memory_space<smem>>) -> (i32, i32) {
    %c0_i32 = arith.constant 0 : i32
    %c0_i32_0 = arith.constant 0 : i32
    %c0_i32_1 = arith.constant 0 : i32
    return %c0_i32, %c0_i32_0 : i32, i32
  }
  func.func @transform_13(%arg0: i32, %arg1: memref<2xi32, #tpu.memory_space<smem>>) -> (i32, i32) {
    %c0_i32 = arith.constant 0 : i32
    %c0_i32_0 = arith.constant 0 : i32
    return %c0_i32, %arg0 : i32, i32
  }
  func.func @transform_14(%arg0: i32, %arg1: memref<2xi32, #tpu.memory_space<smem>>) -> (i32, i32) {
    %c0_i32 = arith.constant 0 : i32
    %c0_i32_0 = arith.constant 0 : i32
    return %c0_i32, %arg0 : i32, i32
  }
  func.func @transform_15(%arg0: i32, %arg1: memref<2xi32, #tpu.memory_space<smem>>) -> (i32, i32) {
    %c0_i32 = arith.constant 0 : i32
    %c0_i32_0 = arith.constant 0 : i32
    return %c0_i32, %arg0 : i32, i32
  }
  func.func @transform_16(%arg0: i32, %arg1: memref<2xi32, #tpu.memory_space<smem>>) -> (i32, i32, i32) {
    %c0_i32 = arith.constant 0 : i32
    %c0_i32_0 = arith.constant 0 : i32
    %c0_i32_1 = arith.constant 0 : i32
    %c0_i32_2 = arith.constant 0 : i32
    return %c0_i32, %c0_i32_0, %c0_i32_1 : i32, i32, i32
  }
  func.func @transform_17(%arg0: i32, %arg1: memref<2xi32, #tpu.memory_space<smem>>) -> (i32, i32, i32) {
    %c0_i32 = arith.constant 0 : i32
    %c0_i32_0 = arith.constant 0 : i32
    %c0_i32_1 = arith.constant 0 : i32
    %c0_i32_2 = arith.constant 0 : i32
    return %c0_i32, %c0_i32_0, %c0_i32_1 : i32, i32, i32
  }
}

</mosaic_0001>

<bundles_post_ra>
// kernel: tpu_custom_call.1
= control target key start
LH: loop header
LB: loop body
LE: loop exit
PB: predicated region body
PF: predicated region fallthrough
CT: control target
= control target key end

     0   :  { %s1610_s30 = smov [#allocation6]   ;;  %s2000_s0 = inlined_call_operand.vmem [shape: s32[2], index: 0, kind: input, shape index: {}]   ;;  %s2001_s1 = inlined_call_operand.vmem [shape: f32[2,2,32], index: 1, kind: input, shape index: {}]   ;;  %s2002_s2 = inlined_call_operand.vmem [shape: f32[2,2,32], index: 2, kind: input, shape index: {}]   ;;  %s2003_s3 = inlined_call_operand.vmem [shape: f32[2,8,32], index: 3, kind: input, shape index: {}]   ;;  %s2004_s4 = inlined_call_operand.vmem [shape: f32[300,16], index: 4, kind: input, shape index: {}]   ;;  %s2005_s5 = inlined_call_operand.vmem [shape: f32[32,32], index: 5, kind: input, shape index: {}]   ;;  %s2006_s6 = inlined_call_operand.vmem [shape: f32[1,32], index: 6, kind: input, shape index: {}]   ;;  %s2007_s7 = inlined_call_operand.vmem [shape: f32[1,32], index: 7, kind: input, shape index: {}]   ;;  %s2008_s8 = inlined_call_operand.vmem [shape: f32[80,128], index: 8, kind: input, shape index: {}]   ;;  %s2009_s9 = inlined_call_operand.vmem [shape: f32[1,128], index: 9, kind: input, shape index: {}]   ;;  %s2010_s10 = inlined_call_operand.vmem [shape: f32[64,128], index: 10, kind: input, shape index: {}]   ;;  %s2011_s11 = inlined_call_operand.vmem [shape: f32[1,128], index: 11, kind: input, shape index: {}]   ;;  %s2012_s12 = inlined_call_operand.vmem [shape: f32[1,32], index: 12, kind: input, shape index: {}]   ;;  %s2013_s13 = inlined_call_operand.vmem [shape: f32[1,32], index: 13, kind: input, shape index: {}]   ;;  %s2014_s14 = inlined_call_operand.vmem [shape: bf16[32,384], index: 14, kind: input, shape index: {}]   ;;  %s2015_s15 = inlined_call_operand.vmem [shape: f32[1,384], index: 15, kind: input, shape index: {}]   ;;  %s2016_s16 = inlined_call_operand.hbm [shape: f32[2,384], index: 16, kind: output, shape index: {0}]   ;;  %s2017_s17 = inlined_call_operand.hbm [shape: f32[2,2,32], index: 17, kind: output, shape index: {1}]   ;;  %s2018_s18 = inlined_call_operand.hbm [shape: f32[2,2,32], index: 18, kind: output, shape index: {2}]  }
   0x1   :  { %2032 = sst [smem:[#allocation27_spill]] %s2000_s0 }
   0x2   :  { %2033 = sst [smem:[#allocation28_spill]] %s2001_s1 }
   0x3   :  { %2034 = sst [smem:[#allocation29_spill]] %s2002_s2 }
   0x4   :  { %2035 = sst [smem:[#allocation30_spill]] %s2003_s3 }
   0x5   :  { %2036 = sst [smem:[#allocation31_spill]] %s2004_s4 }
   0x6   :  { %2037 = sst [smem:[#allocation32_spill]] %s2005_s5 }
   0x7   :  { %2038 = sst [smem:[#allocation33_spill]] %s2012_s12 }
   0x8   :  { %2039 = sst [smem:[#allocation34_spill]] %s2014_s14 }
   0x9   :  { %2040 = sst [smem:[#allocation35_spill]] %s2016_s16 }
   0xa   :  { %s2041_s29 = sld [smem:[#allocation27_spill]] }
  0x10   :  { %s25_s12 = sshll.u32 %s2041_s29, 4  ;;  %s26_s12 = int_to_ptr.vmem [resolvable:$true] %s25_s12 }
  0x11   :  { %28 = dma.vmem_to_smem %s26_s12, 16, %s1610_s30, [#allocation5] }
  0x12   :  { %1580 = dma.done.wait [#allocation5], 16 }
  0x13   :  { %1581 = vsyncadd [#allocation5], 4294967280 }
  0x14   :  { %31 = sfence }
  0x15   :  { %32 = vsyncpa [#allocation9], 0 }
  0x16   :  { %34 = vsyncpa [#allocation9 + $0x1], 0 }
  0x17   :  { %35 = vsyncpa [#allocation11], 0  ;;  %s1720_s0 = smov 0   ;;  %s1722_s19 = smov 0  }
  0x18   :  { %s1724_s1 = smov 0   ;;  %s1726_s20 = smov 0  }
  0x19 LB: > { %2042 = sst [smem:[#allocation20_spill]] %s1596_s0  ;;  %s1741_s12 = sadd.s32 4294967295, %s1608_s20   ;;  %s1608_s20 = sphi %s1726_s20, %s2064_s20   ;;  %s1604_s1 = sphi %s1724_s1, %s2067_s1   ;;  %s1600_s19 = sphi %s1722_s19, %s2066_s19   ;;  %s1596_s0 = sphi %s1720_s0, %s2065_s0  }
  0x1a   : > { %2043 = sst [smem:[#allocation21_spill]] %s1600_s19  ;;  %s1322_s21 = sadd.s32 4294967294, %s1608_s20  }
  0x1b   : > { %2044 = sst [smem:[#allocation22_spill]] %s1604_s1  ;;  %s1745_s22 = sadd.s32 1, %s1608_s20  }
  0x1c   : > { %2045 = sst [smem:[#allocation23_spill]] %s1608_s20  ;;  %s300_s2 = sadd.s32 1, %s1604_s1 }
  0x1d   : > { %2046 = sst [smem:[#allocation24_spill]] %s1745_s22  ;;  %s297_s23 = ssub.s32 %s1608_s20, %s1745_s22 }
  0x1e   : > { %p307_p0 = scmp.ne.s32.totalorder %s1604_s1, %s1600_s19  ;;  %p298_p1 = scmp.eq.s32.totalorder %s297_s23, 0 }
  0x1f   : > { %p308_p2 = scmp.eq.s32.totalorder %s1608_s20, 0  ;;  %p363_p3 = scmp.eq.s32.totalorder %s1741_s12, 2 }
  0x20   : > { %p368_p4 = scmp.ne.s32.totalorder %s1600_s19, %s1596_s0  ;;  %p369_p7 = scmp.eq.s32.totalorder %s1322_s21, 2 }
  0x21   : > { %s1757_s24 = scalar_select %p298_p1, %s1604_s1, %s300_s2  }
  0x22   : > { %p309_p5 = por %p308_p2, %p307_p0  ;;  %p1761_p6 = por %p363_p3, %p307_p0 }
  0x23   : > { %2047 = sst [smem:[#allocation25_spill]] %s1757_s24  ;;  %p1765_p8 = por %p369_p7, %p368_p4 }
  0x24   : > { %p1324_p9 = scmp.ge.s32.totalorder %s1608_s20, 3 }
  0x25   : > { %s2049_s26 = scalar_select %p1765_p8, 1, 0 }
  0x26   : > { %463 = sbr.rel (%p1324_p9) target bundleno = 57 (0x39), region = 64 }
  0x27   : > { %2050 = sst [smem:[#allocation26_spill]] %s2049_s26 }
  0x2b   : > { %466 = sbr.rel (!%p309_p5) target bundleno = 57 (0x39), region = 68  ;;  %s468_s27 = sand.u32 (%p309_p5), 1, %s1604_s1  }
  0x2c   : > { %s1326_s28 = sshll.u32 (%p309_p5), %s1608_s20, 2  ;;  %s1325_s29 = sshll.u32 (%p309_p5), %s468_s27, 4 }
  0x2d   : > { %s2051_s14 = sld [smem:[#allocation34_spill]] (%p309_p5)  ;;  %s470_s21 = scalar_lea.vmem (%p309_p5), [#allocation7], %s1325_s29 }
  0x33   : > { %s472_s23 = scalar_lea.vmem %s2051_s14, %s1326_s28 }
  0x34   : > { %v489_v0 = vld [vmem:[%s472_s23] sm:$0xf]  ;;  %v491_v1 = vld [vmem:[%s472_s23 + $0xc] sm:$0xf]  ;;  %v493_v2 = vld [vmem:[%s472_s23 + $0x18] sm:$0xf] }
  0x35   : > { %490 = vst [vmem:[%s470_s21] sm:$0xf] %v489_v0  ;;  %v495_v3 = vld [vmem:[%s472_s23 + $0x24] sm:$0xf] }
  0x36   : > { %492 = vst [vmem:[%s470_s21 + $0x4] sm:$0xf] %v491_v1 }
  0x37   : > { %494 = vst [vmem:[%s470_s21 + $0x8] sm:$0xf] %v493_v2 }
  0x38   : > { %496 = vst [vmem:[%s470_s21 + $0xc] sm:$0xf] %v495_v3 }
  0x39 PF: > { %p1327_p10 = scmp.ge.s32.totalorder %s1608_s20, 1  ;;  %p533_p11 = scmp.lt.s32.totalorder %s1608_s20, 4 }
  0x3b   : > { %p534_p12 = pnand %p1327_p10, %p533_p11 }
  0x3c   : > { %s1778_s27 = sand.u32 (!%p534_p12), 1, %s1600_s19   ;;  %p592_p13 = scmp.lt.s32.totalorder (!%p534_p12), %s1741_s12, 2 }
  0x3d   : > { %537 = sbr.rel (%p534_p12) target bundleno = 2852 (0xb24), region = 113  ;;  %s1328_s28 = sshll.u32 (!%p534_p12), %s1778_s27, 4 }
  0x3e   : > { %s1329_s29 = sshll.u32 (!%p534_p12), %s1778_s27, 1  ;;  %s1790_s14 = scalar_lea.vmem (!%p534_p12), [#allocation7], %s1328_s28 }
  0x3f   : > { %s1792_s24 = scalar_lea.vmem (!%p534_p12), [#allocation8], %s1329_s29  ;;  %p1330_p0 = scmp.ne.s32.totalorder (!%p534_p12), %s1741_s12, 0 }
  0x42   : > { %s1784_s30 = scalar_select %p592_p13, %s1741_s12, 2 }
  0x43   : > { %599 = sbr.rel (%p1330_p0) target bundleno = 2707 (0xa93), region = 121  ;;  %s600_s1 = sld [smem:[#allocation6]] (!%p1330_p0) }
  0x44   : > { %s2052_s4 = sld [smem:[#allocation31_spill]] (!%p1330_p0) }
  0x4a   : > { %s601_s26 = scalar_lea.vmem %s2052_s4, %s600_s1 }
  0x4b   : > { %v616_v4 = vld [vmem:[%s601_s26] sm:$0x1] }
  0x4c   : > { %617 = vst [vmem:[#allocation2] sm:$0x1] %v616_v4 }
  0x4d   : > { %635 = vsyncadd [#allocation4], 16  ;;  %s1331_s0 = sld [smem:[#allocation6 + $0x1]] }
  0x53   : > { %s637_s2 = scalar_lea.vmem %s2052_s4, %s1331_s0 }
  0x54   : > { %v654_v5 = vld [vmem:[%s637_s2] sm:$0x1] }
  0x55   : > { %655 = vst [vmem:[#allocation2 + $0x1] sm:$0x1] %v654_v5 }
  0x56   : > { %673 = vsyncadd [#allocation4 + $0x1], 16  ;;  %s2053_s5 = sld [smem:[#allocation32_spill]]  ;;  %vm684_vm0 = vcmask 261120   ;;  %v1429_v12 = vld [vmem:[%s2006_s6] ss:$0 sm:$0xff]  ;;  %v730_v25 = vlaneseq }
  0x57   : > { %s2054_s3 = sld [smem:[#allocation30_spill]]  ;;  %v1430_v15 = vld [vmem:[%s2007_s7] ss:$0 sm:$0xff]  ;;  %vm734_vm1 = vcmask 1041409   ;;  %vm737_vm2 = vcmask 58368   ;;  %v1611_v32 = vmov 0  }
  0x58   : > { %v1829_v26 = vand.u32 127, %v730_v25  ;;  %1427 = vset.pattern.permute.xlu2 %v1611_v32  ;;  %1426 = vset.pattern.permute.xlu1 %v1611_v32  ;;  %vm807_vm11 = vcmask 64512  }
  0x59   : > { %1428 = vset.pattern.permute.xlu0 %v1611_v32 }
  0x5c   : > { %v679_v6 = vld [vmem:[%s2053_s5 + $0x18] sm:$0xff]  ;;  %v678_v7 = vld [vmem:[%s2053_s5 + $0x10] sm:$0xff]  ;;  %v677_v9 = vld [vmem:[%s2053_s5 + $0x8] sm:$0xff] }
  0x5d   : > { %703 = vmatpush.msra.mxu0 %v679_v6  ;;  %v674_v8 = vld [vmem:[%s2054_s3] sm:$0xff]  ;;  %v675_v10 = vld [vmem:[%s2054_s3 + $0x8] sm:$0xff] }
  0x5e   : > { %825 = vmatpush.msra.mxu1 %v674_v8  ;;  %852 = vmatpush.msra.mxu2 %v675_v10  ;;  %v676_v11 = vld [vmem:[%s2053_s5] sm:$0xff] }
  0x5f   : > { %704 = vmatpush.msra.mxu0 %v678_v7 }
  0x61   : > { %705 = vmatpush.msra.mxu0 %v677_v9 }
  0x63   : > { %706 = vmatpush.msra.mxu0 %v676_v11 }
  0x64   : > { %1332 = vmatmul.msk.f32.vlgmr.msra.gmra.mxu0 %vm684_vm0, %v674_v8 }
  0x6c   : > { %1333 = vmatmul.msk.f32.gmra.mxu0 %vm684_vm0, %v675_v10 }
  0xe1   : > { %v708_v13 = vpop.f32.mrf.mxu0 }
  0xe2   : > { %v709_v14 = vadd.f32 %v1429_v12, %v708_v13 }
  0xe4   : > { %1431 = vtanh.f32 %v709_v14 }
  0xe9   : > { %v711_v16 = vpop.f32.mrf.mxu0 }
  0xea   : > { %v1432_v17 = vpop.eup %1431  ;;  %v712_v18 = vadd.f32 %v1429_v12, %v711_v16 }
  0xeb   : > { %v720_v19 = vmul.f32 %v1432_v17, %v1430_v15 }
  0xec   : > { %1433 = vtanh.f32 %v712_v18 }
  0xed   : > { %v722_v20 = vsel %vm684_vm0, %v720_v19, 0.0 }
  0xee   : > { %723 = vadd.xlane.f32.xlu0 %v722_v20 }
  0xf2   : > { %v1434_v21 = vpop.eup %1433 }
  0xf3   : > { %v721_v22 = vmul.f32 %v1434_v21, %v1430_v15 }
  0xf5   : > { %v725_v23 = vsel %vm684_vm0, %v721_v22, 0.0 }
  0xf6   : > { %726 = vadd.xlane.f32.xlu0 %v725_v23 }
 0x161   : > { %v724_v24 = vpop.xlane.xlu0 %723 }
 0x162   : > { %v732_v28 = vperm.slane %v724_v24, %v1829_v26 }
 0x169   : > { %v727_v27 = vpop.xlane.xlu0 %726 }
 0x16a   : > { %v733_v29 = vperm.slane %v727_v27, %v1829_v26 }
 0x16c   : > { %v735_v30 = vsel %vm734_vm1, %v733_v29, %v732_v28 }
 0x16d   : > { %v738_v31 = vsel %vm737_vm2, %v735_v30, -inf }
 0x16e   : > { %739 = vmax.xlane.f32.xlu1 %v738_v31 }
 0x1e1   : > { %v740_v33 = vpop.xlane.xlu1 %739 }
 0x1e2   : > { %v742_v34 = vperm.slane %v740_v33, 0  ;;  %v743_v35 = vperm.slane %v740_v33, 1 }
 0x1e4   : > { %v746_v36 = vsub.f32 %v724_v24, %v742_v34  ;;  %v747_v37 = vsub.f32 %v727_v27, %v743_v35 }
 0x1e6   : > { %v748_v38 = vmul.f32 1.442695, %v746_v36  ;;  %v750_v39 = vmul.f32 1.442695, %v747_v37 }
 0x1e8   : > { %1435 = vpow2.f32 %v748_v38 }
 0x1e9   : > { %1437 = vpow2.f32 %v750_v39 }
 0x1ee   : > { %v1436_v40 = vpop.eup %1435 }
 0x1ef   : > { %v1438_v41 = vpop.eup %1437  ;;  %755 = vperm.xlu1 %1426, %v1436_v40  }
 0x1f0   : > { %758 = vperm.xlu2 %1427, %v1438_v41  }
 0x24a   : > { %v759_v42 = vpop.permute.xlu2 %758 }
 0x24b   : > { %v761_v44 = vperm.slane %v759_v42, %v1829_v26 }
 0x261   : > { %v756_v43 = vpop.permute.xlu1 %755 }
 0x262   : > { %v760_v45 = vperm.slane %v756_v43, %v1829_v26 }
 0x264   : > { %v762_v46 = vsel %vm734_vm1, %v761_v44, %v760_v45 }
 0x265   : > { %v764_v47 = vsel %vm737_vm2, %v762_v46, 0.0 }
 0x266   : > { %765 = vadd.xlane.f32.xlu2 %v764_v47 }
 0x2d9   : > { %v766_v48 = vpop.xlane.xlu2 %765 }
 0x2da   : > { %v768_v49 = vperm.slane %v766_v48, 0  ;;  %v769_v50 = vperm.slane %v766_v48, 1 }
 0x2dc   : > { %1439 = vrcp.f32 %v768_v49  ;;  %v783_v57 = vand.u32 2147483648, %v768_v49  ;;  %v798_v58 = vand.u32 2147483648, %v769_v50  ;;  %v781_v60 = vand.u32 2147483647, %v768_v49 }
 0x2dd   : > { %1441 = vrcp.f32 %v769_v50  ;;  %v796_v62 = vand.u32 2147483647, %v769_v50  ;;  %vm777_vm5 = vweird.f32 %v768_v49  ;;  %vm792_vm6 = vweird.f32 %v769_v50 }
 0x2de   : > { %v784_v1 = vor.u32 1.1754944e-38, %v783_v57  ;;  %v799_v2 = vor.u32 1.1754944e-38, %v798_v58  ;;  %vm782_vm9 = vcmp.eq.f32.partialorder %v781_v60, 8.507059e+37 }
 0x2df   : > { %vm797_vm10 = vcmp.eq.f32.partialorder %v796_v62, 8.507059e+37 }
 0x2e2   : > { %v1440_v51 = vpop.eup %1439 }
 0x2e3   : > { %v1442_v52 = vpop.eup %1441  ;;  %v773_v53 = vmul.f32 %v1440_v51, %v768_v49  ;;  %vm778_vm3 = vweird.f32 %v1440_v51 }
 0x2e4   : > { %v788_v54 = vmul.f32 %v1442_v52, %v769_v50  ;;  %vm793_vm4 = vweird.f32 %v1442_v52  ;;  %vm779_vm7 = vmor %vm777_vm5, %vm778_vm3 }
 0x2e5   : > { %v774_v55 = vsub.f32 1.0, %v773_v53  ;;  %vm794_vm8 = vmor %vm792_vm6, %vm793_vm4 }
 0x2e6   : > { %v789_v56 = vsub.f32 1.0, %v788_v54 }
 0x2e7   : > { %v775_v59 = vmul.f32 %v1440_v51, %v774_v55 }
 0x2e8   : > { %v790_v61 = vmul.f32 %v1442_v52, %v789_v56 }
 0x2e9   : > { %v776_v63 = vadd.f32 %v1440_v51, %v775_v59 }
 0x2ea   : > { %v791_v0 = vadd.f32 %v1442_v52, %v790_v61 }
 0x2eb   : > { %v780_v3 = vsel %vm779_vm7, %v1440_v51, %v776_v63 }
 0x2ec   : > { %v795_v4 = vsel %vm794_vm8, %v1442_v52, %v791_v0  ;;  %v785_v5 = vsel %vm782_vm9, %v784_v1, %v780_v3 }
 0x2ed   : > { %v800_v6 = vsel %vm797_vm10, %v799_v2, %v795_v4  ;;  %v786_v7 = vmul.f32 %v1436_v40, %v785_v5 }
 0x2ee   : > { %v801_v8 = vmul.f32 %v1438_v41, %v800_v6 }
 0x2ef   : > { %804 = vperm.xlu1 %1426, %v786_v7  }
 0x2f0   : > { %832 = vperm.xlu0 %1428, %v801_v8  }
 0x361   : > { %v805_v9 = vpop.permute.xlu1 %804 }
 0x362   : > { %v833_v10 = vpop.permute.xlu0 %832  ;;  %v806_v11 = vperm.slane %v805_v9, %v1829_v26 }
 0x363   : > { %v834_v12 = vperm.slane %v833_v10, %v1829_v26 }
 0x364   : > { %1334 = vmatmul.msk.f32.vlgmr.msra.gmra.mxu1 %vm807_vm11, %v806_v11 }
 0x365   : > { %1335 = vmatmul.msk.f32.vlgmr.msra.gmra.mxu2 %vm807_vm11, %v834_v12 }
 0x3e1   : > { %v827_v13 = vpop.f32.mrf.mxu1 }
 0x3e8   : > { %v854_v14 = vpop.f32.mrf.mxu2 }
 0x3e9   : > { %1582 = dma.done.wait [#allocation4], 16 }
 0x3ea   : > { %1583 = vsyncadd [#allocation4], 4294967280  ;;  %v878_v15 = vrot.slane %v854_v14, 7 }
 0x3eb   : > { %1584 = dma.done.wait [#allocation4 + $0x1], 16 }
 0x3ec   : > { %1585 = vsyncadd [#allocation4 + $0x1], 4294967280  ;;  %v879_v16 = vsel %vm734_vm1, %v878_v15, %v827_v13  ;;  %s1612_s19 = smov 16   ;;  %v872_v17 = vld [vmem:[%s2008_s8 + $0x48] sm:$0xff]  ;;  %v871_v18 = vld [vmem:[%s2008_s8 + $0x40] sm:$0xff]  ;;  %s2055_s2 = sld [smem:[#allocation28_spill]] }
 0x3ed   : > { %880 = vrot.lane.b32.xlu0 %v879_v16, %s1612_s19  ;;  %904 = vmatpush.msra.mxu3 %v872_v17  ;;  %v870_v20 = vld [vmem:[%s2008_s8 + $0x38] sm:$0xff]  ;;  %s1613_s29 = smov 48   ;;  %v869_v21 = vld [vmem:[%s2008_s8 + $0x30] sm:$0xff]  ;;  %v868_v22 = vld [vmem:[%s2008_s8 + $0x28] sm:$0xff]  ;;  %vm887_vm12 = vcmask 130048   ;;  %vm889_vm13 = vcmask 392192  }
 0x3ee   : > { %v867_v23 = vld [vmem:[%s2008_s8 + $0x20] sm:$0xff]  ;;  %v866_v24 = vld [vmem:[%s2008_s8 + $0x18] sm:$0xff]  ;;  %v865_v25 = vld [vmem:[%s2008_s8 + $0x10] sm:$0xff]  ;;  %vm894_vm14 = vcmask 654336   ;;  %s2029_s16 = smov 64   ;;  %s2056_s21 = sld [smem:[#allocation29_spill]] }
 0x3ef   : > { %905 = vmatpush.msra.mxu3 %v871_v18  ;;  %v864_v26 = vld [vmem:[%s2008_s8 + $0x8] sm:$0xff]  ;;  %v863_v27 = vld [vmem:[%s2008_s8] sm:$0xff]  ;;  %s1615_s28 = smov 32   ;;  %v966_v59 = vld [vmem:[%s2010_s10 + $0x38] sm:$0xff]  ;;  %vm1053_vm4 = vcmask 254976   ;;  %vm984_vm5 = vcmask 523264  }
 0x3f0   : > { %v862_v29 = vld [vmem:[#allocation2] sm:$0x3]  ;;  %v965_v60 = vld [vmem:[%s2010_s10 + $0x30] sm:$0xff]  ;;  %996 = vmatpush.msrb.mxu1 %v966_v59  ;;  %v964_v61 = vld [vmem:[%s2010_s10 + $0x28] sm:$0xff]  ;;  %s2057_s19 = smov 64   ;;  %s2058_s26 = sld [smem:[#allocation33_spill]] }
 0x3f1   : > { %906 = vmatpush.msra.mxu3 %v870_v20  ;;  %v1443_v33 = vld [vmem:[%s2009_s9] ss:$0 sm:$0xff]  ;;  %v962_v63 = vld [vmem:[%s2010_s10 + $0x18] sm:$0xff]  ;;  %v961_v0 = vld [vmem:[%s2010_s10 + $0x10] sm:$0xff]  ;;  %s1617_s3 = smov 96  }
 0x3f2   : > { %v874_v19 = vld [vmem:[%s2055_s2] sm:$0x3]  ;;  %v1338_v58 = vld [vmem:[%s2055_s2 + $0x2] sm:$0x3]  ;;  %997 = vmatpush.msrb.mxu1 %v965_v60  ;;  %v960_v1 = vld [vmem:[%s2010_s10 + $0x8] sm:$0xff] }
 0x3f3   : > { %907 = vmatpush.msra.mxu3 %v869_v21  ;;  %v963_v62 = vld [vmem:[%s2010_s10 + $0x20] sm:$0xff] }
 0x3f4   : > { %v875_v37 = vld [vmem:[%s2056_s21] sm:$0x3]  ;;  %998 = vmatpush.msrb.mxu1 %v964_v61  ;;  %v1339_v5 = vld [vmem:[%s2056_s21 + $0x2] sm:$0x3] }
 0x3f5   : > { %884 = vrot.lane.b32.xlu0 %v874_v19, %s1613_s29  ;;  %908 = vmatpush.msra.mxu3 %v868_v22  ;;  %v959_v4 = vld [vmem:[%s2010_s10] sm:$0xff] }
 0x3f6   : > { %999 = vmatpush.msrb.mxu1 %v963_v62  ;;  %v1444_v9 = vld [vmem:[%s2011_s11] ss:$0 sm:$0xff] }
 0x3f7   : > { %909 = vmatpush.msra.mxu3 %v867_v23 }
 0x3f8   : > { %1000 = vmatpush.msrb.mxu1 %v962_v63 }
 0x3f9   : > { %910 = vmatpush.msra.mxu3 %v866_v24 }
 0x3fa   : > { %1001 = vmatpush.msrb.mxu1 %v961_v0 }
 0x3fb   : > { %911 = vmatpush.msra.mxu3 %v865_v25 }
 0x3fc   : > { %1002 = vmatpush.msrb.mxu1 %v960_v1 }
 0x3fd   : > { %912 = vmatpush.msra.mxu3 %v864_v26 }
 0x3fe   : > { %1003 = vmatpush.msrb.mxu1 %v959_v4 }
 0x3ff   : > { %913 = vmatpush.msra.mxu3 %v863_v27 }
 0x45f   : > { %v881_v28 = vpop.permute.xlu0 %880 }
 0x460   : > { %v888_v30 = vsel %vm887_vm12, %v862_v29, %v881_v28 }
 0x467   : > { %v885_v31 = vpop.permute.xlu0 %884 }
 0x468   : > { %v890_v32 = vsel %vm889_vm13, %v888_v30, %v885_v31 }
 0x469   : > { %1336 = vmatmul.msk.f32.vlgmr.msra.gmra.mxu3 %vm894_vm14, %v890_v32 }
 0x4ec   : > { %v915_v34 = vpop.f32.mrf.mxu3 }
 0x4ed   : > { %v916_v35 = vadd.f32 %v1443_v33, %v915_v34 }
 0x4ef   : > { %1447 = vtanh.f32 %v916_v35  ;;  %v1337_v38 = vmul.f32 -1.442695, %v916_v35 }
 0x4f1   : > { %1449 = vpow2.f32 %v1337_v38 }
 0x4f5   : > { %v1448_v36 = vpop.eup %1447 }
 0x4f6   : > { %944 = vrot.lane.b32.xlu1 %v1448_v36, %s2029_s16 }
 0x4f7   : > { %v1450_v39 = vpop.eup %1449 }
 0x4f8   : > { %v921_v40 = vadd.f32 1.0, %v1450_v39 }
 0x4fa   : > { %1451 = vrcp.f32 %v921_v40  ;;  %v933_v46 = vand.u32 2147483648, %v921_v40  ;;  %vm927_vm1 = vweird.f32 %v921_v40  ;;  %v931_v47 = vand.u32 2147483647, %v921_v40 }
 0x4fc   : > { %v934_v49 = vor.u32 1.1754944e-38, %v933_v46  ;;  %vm932_vm3 = vcmp.eq.f32.partialorder %v931_v47, 8.507059e+37 }
 0x4fe   : > { %939 = vrot.lane.b32.xlu1 %v875_v37, %s1615_s28  ;;  %v1616_v37 = vmov 32.0  }
 0x500   : > { %v1452_v41 = vpop.eup %1451 }
 0x501   : > { %v923_v42 = vmul.f32 %v1452_v41, %v921_v40  ;;  %vm928_vm15 = vweird.f32 %v1452_v41 }
 0x502   : > { %vm929_vm2 = vmor %vm927_vm1, %vm928_vm15 }
 0x503   : > { %v924_v43 = vsub.f32 1.0, %v923_v42 }
 0x505   : > { %v925_v44 = vmul.f32 %v1452_v41, %v924_v43 }
 0x506   : > { %977 = vrot.lane.b32.xlu1 %v1338_v58, %s1615_s28 }
 0x507   : > { %v926_v45 = vadd.f32 %v1452_v41, %v925_v44 }
 0x509   : > { %v930_v48 = vsel %vm929_vm2, %v1452_v41, %v926_v45 }
 0x50a   : > { %v935_v51 = vsel %vm932_vm3, %v934_v49, %v930_v48  ;;  %v1445_v48 = vld [vmem:[%s2058_s26] ss:$0 sm:$0xff] }
 0x50b   : > { %v1446_v49 = vld [vmem:[%s2013_s13] ss:$0 sm:$0xff] }
 0x568   : > { %v945_v50 = vpop.permute.xlu1 %944 }
 0x569   : > { %v947_v52 = vmul.f32 %v945_v50, %v935_v51 }
 0x56b   : > { %949 = vrot.lane.b32.xlu2 %v947_v52, %s1615_s28 }
 0x570   : > { %v940_v53 = vpop.permute.xlu1 %939 }
 0x571   : > { %v942_v54 = vmul.f32 %v940_v53, %v935_v51 }
 0x578   : > { %v978_v6 = vpop.permute.xlu1 %977 }
 0x5c5   : > { %v950_v55 = vpop.permute.xlu2 %949 }
 0x5c6   : > { %v1884_v56 = vadd.f32 %v950_v55, %v942_v54 }
 0x5c8   : > { %1453 = vtanh.f32 %v1884_v56 }
 0x5ce   : > { %v1454_v57 = vpop.eup %1453 }
 0x5cf   : > { %955 = vrot.lane.b32.xlu2 %v1454_v57, %s2029_s16 }
 0x629   : > { %v956_v2 = vpop.permute.xlu2 %955 }
 0x62a   : > { %v958_v3 = vmul.f32 %v956_v2, %v935_v51 }
 0x62c   : > { %973 = vrot.lane.b32.xlu0 %v958_v3, %s1615_s28 }
 0x634   : > { %1029 = vrot.lane.b32.xlu0 %v1339_v5, %s1615_s28 }
 0x69e   : > { %v974_v7 = vpop.permute.xlu0 %973 }
 0x69f   : > { %1054 = vst.msk [vmem:[#allocation10] sm:$0x3] %vm1053_vm4, %v974_v7  ;;  %v980_v8 = vsel %vm684_vm0, %v974_v7, %v978_v6 }
 0x6a0   : > { %1340 = vmatmul.msk.f32.vlgmr.msrb.gmra.mxu1 %vm984_vm5, %v980_v8 }
 0x6a6   : > { %v1030_v28 = vpop.permute.xlu0 %1029 }
 0x71d   : > { %v1005_v10 = vpop.f32.mrf.mxu1 }
 0x71e   : > { %v1006_v11 = vadd.f32 %v1444_v9, %v1005_v10 }
 0x720   : > { %1455 = vtanh.f32 %v1006_v11  ;;  %v1341_v13 = vmul.f32 -1.442695, %v1006_v11 }
 0x722   : > { %1457 = vpow2.f32 %v1341_v13 }
 0x726   : > { %v1456_v12 = vpop.eup %1455 }
 0x727   : > { %1034 = vrot.lane.b32.xlu2 %v1456_v12, %s2057_s19 }
 0x728   : > { %v1458_v14 = vpop.eup %1457 }
 0x729   : > { %v1011_v15 = vadd.f32 1.0, %v1458_v14 }
 0x72b   : > { %1459 = vrcp.f32 %v1011_v15  ;;  %v1023_v21 = vand.u32 2147483648, %v1011_v15  ;;  %vm1017_vm6 = vweird.f32 %v1011_v15  ;;  %v1021_v22 = vand.u32 2147483647, %v1011_v15 }
 0x72d   : > { %v1024_v24 = vor.u32 1.1754944e-38, %v1023_v21  ;;  %vm1022_vm8 = vcmp.eq.f32.partialorder %v1021_v22, 8.507059e+37 }
 0x731   : > { %v1460_v16 = vpop.eup %1459 }
 0x732   : > { %v1013_v17 = vmul.f32 %v1460_v16, %v1011_v15  ;;  %vm1018_vm0 = vweird.f32 %v1460_v16 }
 0x733   : > { %vm1019_vm7 = vmor %vm1017_vm6, %vm1018_vm0 }
 0x734   : > { %v1014_v18 = vsub.f32 1.0, %v1013_v17 }
 0x736   : > { %v1015_v19 = vmul.f32 %v1460_v16, %v1014_v18 }
 0x738   : > { %v1016_v20 = vadd.f32 %v1460_v16, %v1015_v19 }
 0x73a   : > { %v1020_v23 = vsel %vm1019_vm7, %v1460_v16, %v1016_v20 }
 0x73b   : > { %v1025_v25 = vsel %vm1022_vm8, %v1024_v24, %v1020_v23 }
 0x73c   : > { %v1032_v29 = vmul.f32 %v1030_v28, %v1025_v25 }
 0x781   : > { %v1035_v26 = vpop.permute.xlu2 %1034 }
 0x782   : > { %v1037_v27 = vmul.f32 %v1035_v26, %v1025_v25 }
 0x784   : > { %1039 = vrot.lane.b32.xlu1 %v1037_v27, %s1615_s28 }
 0x7f6   : > { %v1040_v30 = vpop.permute.xlu1 %1039 }
 0x7f7   : > { %v1042_v31 = vadd.f32 %v1040_v30, %v1032_v29 }
 0x7f9   : > { %1461 = vtanh.f32 %v1042_v31 }
 0x7fa   : > { %1463 = vrcp.f32 %v1616_v37 }
 0x7ff   : > { %v1462_v32 = vpop.eup %1461 }
 0x800   : > { %1045 = vrot.lane.b32.xlu2 %v1462_v32, %s2057_s19  ;;  %v1464_v38 = vpop.eup %1463 }
 0x801   : > { %v1070_v39 = vmul.f32 32.0, %v1464_v38  ;;  %vm1074_vm9 = vweird.f32 %v1464_v38 }
 0x803   : > { %v1071_v40 = vsub.f32 1.0, %v1070_v39 }
 0x805   : > { %v1072_v41 = vmul.f32 %v1464_v38, %v1071_v40 }
 0x807   : > { %v1073_v42 = vadd.f32 %v1464_v38, %v1072_v41 }
 0x809   : > { %v1075_v43 = vsel %vm1074_vm9, %v1464_v38, %v1073_v42 }
 0x85a   : > { %v1046_v33 = vpop.permute.xlu2 %1045 }
 0x85b   : > { %v1048_v34 = vmul.f32 %v1046_v33, %v1025_v25 }
 0x85d   : > { %1050 = vrot.lane.b32.xlu0 %v1048_v34, %s1615_s28 }
 0x8cf   : > { %v1051_v35 = vpop.permute.xlu0 %1050 }
 0x8d0   : > { %1055 = vst.msk [vmem:[#allocation10 + $0x2] sm:$0x3] %vm1053_vm4, %v1051_v35  ;;  %v1066_v36 = vsel %vm1053_vm4, %v1051_v35, 0.0 }
 0x8d1   : > { %1067 = vadd.xlane.f32.xlu1 %v1066_v36 }
 0x944   : > { %v1068_v44 = vpop.xlane.xlu1 %1067 }
 0x945   : > { %v1076_v45 = vmul.f32 %v1075_v43, %v1068_v44 }
 0x947   : > { %v1077_v46 = vsub.f32 %v1048_v34, %v1076_v45 }
 0x949   : > { %v1078_v47 = vmul.f32 %v1077_v46, %v1077_v46 }
 0x94b   : > { %1080 = vrot.lane.b32.xlu2 %v1078_v47, %s1615_s28 }
 0x953   : > { %1102 = vrot.lane.b32.xlu2 %v1445_v48, %s1617_s3 }
 0x95b   : > { %1109 = vrot.lane.b32.xlu2 %v1446_v49, %s1617_s3 }
 0x963   : > { %1058 = vrot.lane.b32.xlu2 %v1884_v56, %s1617_s3 }
 0x96b   : > { %1060 = vrot.lane.b32.xlu2 %v1042_v31, %s1617_s3 }
 0x9a5   : > { %v1081_v50 = vpop.permute.xlu2 %1080 }
 0x9a6   : > { %v1083_v51 = vsel %vm1053_vm4, %v1081_v50, 0.0 }
 0x9a7   : > { %1084 = vadd.xlane.f32.xlu0 %v1083_v51 }
 0x9ad   : > { %v1103_v52 = vpop.permute.xlu2 %1102 }
 0x9b5   : > { %v1110_v53 = vpop.permute.xlu2 %1109 }
 0x9bd   : > { %v1059_v54 = vpop.permute.xlu2 %1058 }
 0x9be   : > { %1064 = vst.msk [vmem:[#allocation12] sm:$0x3] %vm1053_vm4, %v1059_v54 }
 0x9c5   : > { %v1061_v55 = vpop.permute.xlu2 %1060 }
 0x9c6   : > { %1065 = vst.msk [vmem:[#allocation12 + $0x2] sm:$0x3] %vm1053_vm4, %v1061_v55 }
 0xa1a   : > { %v1085_v57 = vpop.xlane.xlu0 %1084 }
 0xa1b   : > { %v1086_v58 = vmul.f32 %v1085_v57, %v1075_v43 }
 0xa1d   : > { %v1087_v59 = vadd.f32 1e-05, %v1086_v58 }
 0xa1f   : > { %1465 = vrsqrt.f32 %v1087_v59  ;;  %vm1094_vm11 = vweird.f32 %v1087_v59 }
 0xa25   : > { %v1466_v60 = vpop.eup %1465 }
 0xa26   : > { %v1089_v61 = vmul.f32 %v1466_v60, %v1087_v59  ;;  %vm1095_vm10 = vweird.f32 %v1466_v60 }
 0xa27   : > { %vm1096_vm12 = vmor %vm1094_vm11, %vm1095_vm10 }
 0xa28   : > { %v1090_v56 = vmul.f32 %v1466_v60, %v1089_v61 }
 0xa2a   : > { %v1091_v62 = vmul.f32 0.5, %v1090_v56 }
 0xa2c   : > { %v1092_v63 = vsub.f32 1.5, %v1091_v62 }
 0xa2e   : > { %v1093_v0 = vmul.f32 %v1466_v60, %v1092_v63 }
 0xa30   : > { %v1097_v1 = vsel %vm1096_vm12, %v1466_v60, %v1093_v0 }
 0xa31   : > { %v1098_v2 = vmul.f32 %v1097_v1, %v1077_v46 }
 0xa33   : > { %v1105_v3 = vmul.f32 %v1103_v52, %v1098_v2 }
 0xa35   : > { %v1112_v4 = vadd.f32 %v1110_v53, %v1105_v3 }
 0xa37   : > { %1114 = vrot.lane.b32.xlu2 %v1112_v4, %s1615_s28 }
 0xa91   : > { %v1115_v5 = vpop.permute.xlu2 %1114 }
 0xa92   : > { %1117 = vst.msk [vmem:[#allocation3] sm:$0x3] %vm1053_vm4, %v1115_v5 }
 0xa93 PF: > { %v1362_v6 = vld [vmem:[%s1790_s14 + $0x8] sm:$0xff]  ;;  %v1361_v7 = vld [vmem:[%s1790_s14] sm:$0xff]  ;;  %vm1140_vm13 = vcmask 261120   ;;  %s1184_s28 = sshll.u32 %s2017_s17, 4  ;;  %s1618_s23 = smov [#allocation10]   ;;  %s1185_s28 = int_to_ptr.hbm [resolvable:$true] %s1184_s28 }
 0xa94   : > { %1150 = vmatpush.bf16.msra.mxu0 %v1362_v6  ;;  %s1182_s19 = sshll.u32 %s1618_s23, 4  ;;  %s1619_s1 = smov 32   ;;  %s1183_s19 = int_to_ptr.vmem [resolvable:$true] %s1182_s19 }
 0xa95   : > { %s1620_s22 = smov 2   ;;  %s1198_s3 = sshll.u32 %s2018_s18, 4  ;;  %s1199_s3 = int_to_ptr.hbm [resolvable:$true] %s1198_s3 }
 0xa96   : > { %1365 = dma.vmem_to_hbm [thread:$0]  (%p363_p3), %s1183_s19, 64, %s1185_s28, [#allocation11], %s1619_s1, %s1619_s1, %s1620_s22  }
 0xa97   : > { %s1621_s16 = smov [#allocation12]   ;;  %s1352_s20 = sshll.u32 %s1741_s12, 1 }
 0xa98   : > { %1151 = vmatpush.bf16.msra.mxu0 %v1361_v7  ;;  %s1196_s0 = sshll.u32 %s1621_s16, 4  ;;  %s2059_s2 = sld [smem:[#allocation35_spill]]  ;;  %s1197_s0 = int_to_ptr.vmem [resolvable:$true] %s1196_s0 }
 0xa99   : > { %v1118_v8 = vld [vmem:[#allocation3] sm:$0x3]  ;;  %1367 = dma.vmem_to_hbm [thread:$0]  (%p363_p3), %s1197_s0, 64, %s1199_s3, [#allocation11], %s1619_s1, %s1619_s1, %s1620_s22  }
 0xa9a   : > { %v1119_v9 = vpack.c.bf16 %v1118_v8, %v1118_v8  ;;  %s2060_s19 = scalar_lea.vmem %s2015_s15, %s1784_s30  ;;  %s1171_s14 = sshll.u32 %s1792_s24, 4  ;;  %s1172_s14 = int_to_ptr.vmem [resolvable:$true] %s1171_s14 }
 0xa9b   : > { %v1467_v10 = vld [vmem:[%s2060_s19] ss:$0 sm:$0xff]  ;;  %s1159_s16 = scalar_lea.sflag [#allocation9], %s1778_s27 }
 0xa9c   : > { %1350 = vmatmul.msk.bf16.vlgmr.msra.gmra.mxu0 %vm1140_vm13, %v1119_v9 }
 0xa9e   : > { %s1169_s4 = scalar_lea.hbm %s2059_s2, %s1352_s20  ;;  %s1556_s5 = scalar_lea.hbm %s2059_s2, 6 }
 0xa9f   : > { %s1173_s26 = sshll.u32 %s1169_s4, 4  ;;  %s1174_s26 = int_to_ptr.hbm [resolvable:$true] %s1173_s26 }
 0xaa0   : > { %s1550_s1 = sshra.s32 %s1174_s26, 4  ;;  %s1551_s1 = int_to_ptr.hbm [resolvable:$true] %s1550_s1 }
 0xaa1   : > { %s1552_s22 = scalar_lea.hbm %s1551_s1, 2  ;;  %p1557_p5 = scmp.lt.s32.totalorder %s1551_s1, %s2059_s2 }
 0xaa2   : > { %p1553_p1 = scmp.ne.s32.totalorder %s1551_s1, %s1552_s22  ;;  %p1558_p7 = scmp.lt.s32.totalorder %s1556_s5, %s1552_s22 }
 0xaa4   : > { %p1554_p2 = pnand %p1553_p1, %p1761_p6  ;;  %p1559_p9 = por %p1558_p7, %p1557_p5 }
 0xaa6   : > { %p1555_p4 = pneg %p1554_p2 }
 0xaa8   : > { %p1560_p10 = pnand %p1559_p9, %p1555_p4 }
 0xb19   : > { %v1153_v11 = vpop.f32.mrf.mxu0 }
 0xb1a   : > { %v1154_v12 = vadd.f32 %v1467_v10, %v1153_v11 }
 0xb1c   : > { %1157 = vst [vmem:[%s1792_s24] sm:$0x3] %v1154_v12 }
 0xb1d   : > { %1563 = shalt.err (!%p1560_p10)
}
 0xb1e   : > { %1363 = dma.vmem_to_hbm [thread:$0]  (%p1761_p6), %s1172_s14, 32, %s1174_s26, %s1159_s16  }
 0xb21   : > { %v1155_v13 = vpop.f32.mrf.mxu0 }
 0xb22   : > { %1587 = dma.done.wait (%p363_p3), [#allocation11], 128  }
 0xb23   : > { %1589 = vsyncadd (%p363_p3), [#allocation11], 4294967168 }
 0xb24 PF: > { %s2061_s4 = sld [smem:[#allocation23_spill]] }
 0xb25   : > { %s2062_s24 = sld [smem:[#allocation20_spill]] }
 0xb2a   : > { %p1381_p11 = scmp.ge.s32.totalorder %s2061_s4, 2 }
 0xb2b   : > { %s1223_s29 = sand.u32 1, %s2062_s24  }
 0xb2c   : > { %p1374_p12 = pnand %p1381_p11, %p1765_p8  ;;  %s1224_s23 = scalar_lea.sflag [#allocation9], %s1223_s29 }
 0xb2e   : > { %p1375_p13 = pneg %p1374_p12 }
 0xb30   : > { %1591 = dma.done.wait (%p1375_p13), %s1224_s23, 32  }
 0xb31   : > { %1593 = vsyncadd (%p1375_p13), %s1224_s23, 4294967264  ;;  %s2064_s20 = sld [smem:[#allocation24_spill]] }
 0xb32   : > { %s2065_s0 = sld [smem:[#allocation21_spill]] }
 0xb33   : > { %s2066_s19 = sld [smem:[#allocation22_spill]] }
 0xb34   : > { %s2067_s1 = sld [smem:[#allocation25_spill]] }
 0xb37   : > { %p38_p6 = scmp.ge.s32.totalorder %s2064_s20, 5  }
 0xb39   :  { %40 = sbr.rel (!%p38_p6) target bundleno = 25 (0x19), region = 255 }
 0xb3e   :  { %1230 = vsyncpa [#allocation9], 1 }
 0xb3f   :  { %1232 = vsyncpa [#allocation9 + $0x1], 1 }
 0xb40   :  { %1233 = vsyncpa [#allocation11], 1 }
 0xb41   :  { %1234 = vsyncmov [#allocation4] }
 0xb44   :  { %s1235_s12 = vpop.sfrf %1234 }
 0xb45   :  { %p1359_p3 = scmp.ne.s32.totalorder %s1235_s12, 0 }
 0xb47   :  { %1239 = shalt.err (%p1359_p3)  }
 0xb48   :  { %1241 = vsyncmov [#allocation4 + $0x1] }
 0xb4b   :  { %s1242_s25 = vpop.sfrf %1241 }
 0xb4c   :  { %p1360_p8 = scmp.ne.s32.totalorder %s1242_s25, 0 }
 0xb4e   :  { %1246 = shalt.err (%p1360_p8)  }

</bundles_post_ra>
